<compile_context>
chip_gen: v7x
topology: tpu7x:2x2x1
jax: 0.10.0
libtpu: 0.0.40
codegen_flags: <defaults>
</compile_context>

<pallas_src>
import jax
import jax.numpy as jnp
from jax.experimental import pallas as pl
from jax.experimental.pallas import tpu as pltpu

EPS_BN = 1e-5


# ------------------------------ fused kernel --------------------------------

def gin_fused_kernel(x_ref, eattr_ref, gmat_ref, smat_ref, pmat_ref,
                     wne_ref, bne_ref, wee_ref, bee_ref,
                     w1_ref, b1_ref, w2_ref, b2_ref,
                     wfc_ref, bfc_ref,
                     logits_ref, pooled_ref,
                     h_sc, ea_sc):
    """Grid axis 0 iterates over GIN layers ("arbitrary" / sequential).

    Persistent VMEM scratch:
      h_sc  [N, H] f32 : node features carried across layers
      ea_sc [E, H] f32 : encoded edge attributes (computed once at layer 0)
    """
    layer = pl.program_id(0)
    n_layers = pl.num_programs(0)

    # ---- layer 0: node / edge encoders (Linear) ----
    @pl.when(layer == 0)
    def _encode():
        h_sc[...] = (jnp.dot(x_ref[...], wne_ref[...],
                             preferred_element_type=jnp.float32) + bne_ref[...])
        ea_sc[...] = (jnp.dot(eattr_ref[...], wee_ref[...],
                              preferred_element_type=jnp.float32) + bee_ref[...])

    h = h_sc[...]                                             # [N, H] f32

    # ---- GINEConv aggregation ----
    # x_src[e] = x[src(e)]           (one-hot gather as bf16 MXU matmul)
    # agg[i]   = sum_e att[e] * relu(x_src[e] + ea[e])  for tgt(e) = i
    #            (edge attention folded into the scatter matrix)
    # TODO(synk): at large E/N replace the one-hot gather with a scalar-prefetch
    # row gather (PrefetchScalarGridSpec + pl.Element) and tile N/E for VMEM.
    x_src = jnp.dot(gmat_ref[...], h.astype(jnp.bfloat16),
                    preferred_element_type=jnp.float32)        # [E, H]
    msg = jnp.maximum(x_src + ea_sc[...], 0.0)                 # relu(x_j + ea)
    agg = jnp.dot(smat_ref[...], msg.astype(jnp.bfloat16),
                  preferred_element_type=jnp.float32)          # [N, H]
    z = (h + agg).astype(jnp.bfloat16)                         # (1+eps)*x + agg, eps=0

    # ---- GINEConv nn() with BatchNorms folded into the Linears ----
    #   Linear1+BN_mlp -> ReLU -> Linear2+BatchNormalNorm1d -> ReLU
    # (dropout is the identity in eval mode)
    h1 = jnp.maximum(
        jnp.dot(z, w1_ref[0], preferred_element_type=jnp.float32) + b1_ref[0],
        0.0)
    h2 = jnp.maximum(
        jnp.dot(h1.astype(jnp.bfloat16), w2_ref[0],
                preferred_element_type=jnp.float32) + b2_ref[0],
        0.0)
    h_sc[...] = h2

    # ---- last layer: global_add_pool + fc_out ----
    @pl.when(layer == n_layers - 1)
    def _pool_fc():
        pooled = jnp.dot(pmat_ref[...], h2.astype(jnp.bfloat16),
                         preferred_element_type=jnp.float32)   # [G, H]
        pooled_ref[...] = pooled
        logits_ref[...] = (jnp.dot(pooled.astype(jnp.bfloat16), wfc_ref[...],
                                   preferred_element_type=jnp.float32)
                           + bfc_ref[...])


# --------------------------- parameter preparation ---------------------------

def init_params(key, x_dim, edge_attr_dim, hidden, num_class, n_layers):
    """Raw (PyTorch-like) parameters: Linears + eval-mode BN statistics."""
    def dense(k, fan_in, fan_out):
        kw, kb = jax.random.split(k)
        w = jax.random.normal(kw, (fan_in, fan_out), jnp.float32) * (1.0 / jnp.sqrt(fan_in))
        b = jax.random.normal(kb, (1, fan_out), jnp.float32) * 0.05
        return w, b

    def bn(k, dim):
        kg, kb, km, kv = jax.random.split(k, 4)
        gamma = 1.0 + 0.1 * jax.random.normal(kg, (1, dim), jnp.float32)
        beta = 0.1 * jax.random.normal(kb, (1, dim), jnp.float32)
        mean = 0.1 * jax.random.normal(km, (1, dim), jnp.float32)
        var = 0.5 + jax.random.uniform(kv, (1, dim), jnp.float32)
        return gamma, beta, mean, var

    keys = jax.random.split(key, 4 + 3 * n_layers)
    params = {
        "node_enc": dense(keys[0], x_dim, hidden),
        "edge_enc": dense(keys[1], edge_attr_dim, hidden),
        "fc_out": dense(keys[2], hidden, num_class),
        "layers": [],
    }
    for i in range(n_layers):
        k1, k2, k3 = keys[3 + 3 * i], keys[4 + 3 * i], keys[5 + 3 * i]
        w1, b1 = dense(k1, hidden, hidden)
        w2, b2 = dense(k2, hidden, hidden)
        bn_mlp = bn(jax.random.fold_in(k3, 0), hidden)
        # BatchNormalNorm1d assumed BatchNorm1d-style eval normalization.
        bn_out = bn(jax.random.fold_in(k3, 1), hidden)
        params["layers"].append(
            {"w1": w1, "b1": b1, "w2": w2, "b2": b2,
             "bn_mlp": bn_mlp, "bn_out": bn_out})
    return params


def _fold_bn(w, b, bn_params):
    """Fold eval-mode BatchNorm (y*s + t) into the preceding Linear."""
    gamma, beta, mean, var = bn_params
    s = gamma * jax.lax.rsqrt(var + EPS_BN)        # [1, H]
    return w * s, b * s + beta - mean * s


def prepare_params(params):
    """BN folding + layer stacking + bf16 casting of matmul operands."""
    w1s, b1s, w2s, b2s = [], [], [], []
    for lp in params["layers"]:
        w1f, b1f = _fold_bn(lp["w1"], lp["b1"], lp["bn_mlp"])
        w2f, b2f = _fold_bn(lp["w2"], lp["b2"], lp["bn_out"])
        w1s.append(w1f); b1s.append(b1f); w2s.append(w2f); b2s.append(b2f)
    wne, bne = params["node_enc"]
    wee, bee = params["edge_enc"]
    wfc, bfc = params["fc_out"]
    return {
        "wne": wne.astype(jnp.bfloat16), "bne": bne,
        "wee": wee.astype(jnp.bfloat16), "bee": bee,
        "w1": jnp.stack(w1s).astype(jnp.bfloat16), "b1": jnp.stack(b1s),
        "w2": jnp.stack(w2s).astype(jnp.bfloat16), "b2": jnp.stack(b2s),
        "wfc": wfc.astype(jnp.bfloat16), "bfc": bfc,
    }


# -------------------------------- forward pass -------------------------------

def gin_norm_forward(folded, x, edge_index, batch, edge_attr, edge_atten,
                     num_graphs):
    N = x.shape[0]
    E = edge_attr.shape[0]
    H = folded["wne"].shape[1]
    C = folded["wfc"].shape[1]
    L = folded["w1"].shape[0]
    src, tgt = edge_index[0], edge_index[1]

    # One-hot gather / scatter / pool matrices (plain-JAX glue), bf16 operands.
    # edge attention is folded into the scatter matrix.
    gmat = jax.nn.one_hot(src, N, dtype=jnp.float32).astype(jnp.bfloat16)          # [E, N]
    smat = (jax.nn.one_hot(tgt, N, dtype=jnp.float32) * edge_atten).T.astype(jnp.bfloat16)  # [N, E]
    pmat = jax.nn.one_hot(batch, num_graphs, dtype=jnp.float32).T.astype(jnp.bfloat16)      # [G, N]

    xb = x.astype(jnp.bfloat16)
    eab = edge_attr.astype(jnp.bfloat16)

    def full2d(a):
        # whole array resident in VMEM, same block every layer step
        return pl.BlockSpec(a.shape, lambda l: (0, 0))

    def per_layer3d(a):
        # one layer slab [1, ...] per grid step
        return pl.BlockSpec((1,) + a.shape[1:], lambda l: (l, 0, 0))

    in_arrays = (xb, eab, gmat, smat, pmat,
                 folded["wne"], folded["bne"], folded["wee"], folded["bee"],
                 folded["w1"], folded["b1"], folded["w2"], folded["b2"],
                 folded["wfc"], folded["bfc"])
    in_specs = [full2d(xb), full2d(eab), full2d(gmat), full2d(smat), full2d(pmat),
                full2d(folded["wne"]), full2d(folded["bne"]),
                full2d(folded["wee"]), full2d(folded["bee"]),
                per_layer3d(folded["w1"]), per_layer3d(folded["b1"]),
                per_layer3d(folded["w2"]), per_layer3d(folded["b2"]),
                full2d(folded["wfc"]), full2d(folded["bfc"])]

    out_shape = (jax.ShapeDtypeStruct((num_graphs, C), jnp.float32),
                 jax.ShapeDtypeStruct((num_graphs, H), jnp.float32))
    out_specs = (pl.BlockSpec((num_graphs, C), lambda l: (0, 0)),
                 pl.BlockSpec((num_graphs, H), lambda l: (0, 0)))

    grid_spec = pltpu.PrefetchScalarGridSpec(
        num_scalar_prefetch=0,
        grid=(L,),
        in_specs=in_specs,
        out_specs=out_specs,
        scratch_shapes=[pltpu.VMEM((N, H), jnp.float32),   # node features
                        pltpu.VMEM((E, H), jnp.float32)],  # encoded edge attrs
    )

    logits, pooled = pl.pallas_call(
        gin_fused_kernel,
        out_shape=out_shape,
        grid_spec=grid_spec,
        compiler_params=pltpu.CompilerParams(
            dimension_semantics=("arbitrary",)),   # layers are sequential
    )(*in_arrays)
    return logits, pooled


# ----------------------------------- main ------------------------------------

if __name__ == "__main__":
    key = jax.random.PRNGKey(0)

    # small, GIN-consistent shapes; HIDDEN chosen as a multiple of 128 so all
    # node-feature stores are lane-dense.
    N, E, G = 16, 32, 2            # nodes, edges, graphs
    X_DIM, EA_DIM = 8, 4           # raw node / edge feature dims
    HIDDEN, N_LAYERS = 128, 2
    NUM_CLASS = 3                  # multi-class -> fc_out maps H -> num_class

    k_x, k_ea, k_att, k_src, k_tgt, k_p = jax.random.split(key, 6)
    x = jax.random.normal(k_x, (N, X_DIM), jnp.float32)
    edge_attr = jax.random.normal(k_ea, (E, EA_DIM), jnp.float32)
    edge_atten = jax.random.uniform(k_att, (E, 1), jnp.float32)

    # first half of edges inside graph 0 (nodes 0..7), second half inside graph 1
    src0 = jax.random.randint(k_src, (E // 2,), 0, N // 2)
    tgt0 = jax.random.randint(k_tgt, (E // 2,), 0, N // 2)
    src1 = jax.random.randint(jax.random.fold_in(k_src, 1), (E // 2,), N // 2, N)
    tgt1 = jax.random.randint(jax.random.fold_in(k_tgt, 1), (E // 2,), N // 2, N)
    edge_index = jnp.stack([jnp.concatenate([src0, src1]),
                            jnp.concatenate([tgt0, tgt1])], axis=0).astype(jnp.int32)
    batch = jnp.concatenate([jnp.zeros(N // 2, jnp.int32),
                             jnp.ones(N // 2, jnp.int32)])

    params = init_params(k_p, X_DIM, EA_DIM, HIDDEN, NUM_CLASS, N_LAYERS)
    folded = prepare_params(params)

    logits, pooled = gin_norm_forward(
        folded, x, edge_index, batch, edge_attr, edge_atten, num_graphs=G)
    jax.block_until_ready((logits, pooled))

    assert logits.shape == (G, NUM_CLASS) and pooled.shape == (G, HIDDEN)
    assert jnp.all(jnp.isfinite(logits)) and jnp.all(jnp.isfinite(pooled))
    print("KERNEL_OK")
</pallas_src>

<mosaic_0001>
module attributes {stable_mosaic.version = 11 : i64} {
  func.func @gin_fused_kernel(%arg0: i32, %arg1: memref<16x8xbf16, #tpu.memory_space<vmem>>, %arg2: memref<32x4xbf16, #tpu.memory_space<vmem>>, %arg3: memref<32x16xbf16, #tpu.memory_space<vmem>>, %arg4: memref<16x32xbf16, #tpu.memory_space<vmem>>, %arg5: memref<2x16xbf16, #tpu.memory_space<vmem>>, %arg6: memref<8x128xbf16, #tpu.memory_space<vmem>>, %arg7: memref<1x128xf32, #tpu.memory_space<vmem>>, %arg8: memref<4x128xbf16, #tpu.memory_space<vmem>>, %arg9: memref<1x128xf32, #tpu.memory_space<vmem>>, %arg10: memref<1x128x128xbf16, #tpu.memory_space<vmem>>, %arg11: memref<1x1x128xf32, #tpu.memory_space<vmem>>, %arg12: memref<1x128x128xbf16, #tpu.memory_space<vmem>>, %arg13: memref<1x1x128xf32, #tpu.memory_space<vmem>>, %arg14: memref<128x3xbf16, #tpu.memory_space<vmem>>, %arg15: memref<1x3xf32, #tpu.memory_space<vmem>>, %arg16: memref<2x3xf32, #tpu.memory_space<vmem>>, %arg17: memref<2x128xf32, #tpu.memory_space<vmem>>, %arg18: memref<16x128xf32, #tpu.memory_space<vmem>>, %arg19: memref<32x128xf32, #tpu.memory_space<vmem>>) attributes {dimension_semantics = [#tpu.dimension_semantics<arbitrary>], iteration_bounds = array<i64: 2>, scalar_prefetch = 0 : i64, scratch_operands = 2 : i64, tpu.core_type = #tpu.core_type<tc>, window_params = [{pipeline_mode = #tpu.pipeline_mode<synchronous>, transform_indices = @transform_0, window_bounds = array<i64: 16, 8>}, {pipeline_mode = #tpu.pipeline_mode<synchronous>, transform_indices = @transform_1, window_bounds = array<i64: 32, 4>}, {pipeline_mode = #tpu.pipeline_mode<synchronous>, transform_indices = @transform_2, window_bounds = array<i64: 32, 16>}, {pipeline_mode = #tpu.pipeline_mode<synchronous>, transform_indices = @transform_3, window_bounds = array<i64: 16, 32>}, {pipeline_mode = #tpu.pipeline_mode<synchronous>, transform_indices = @transform_4, window_bounds = array<i64: 2, 16>}, {pipeline_mode = #tpu.pipeline_mode<synchronous>, transform_indices = @transform_5, window_bounds = array<i64: 8, 128>}, {pipeline_mode = #tpu.pipeline_mode<synchronous>, transform_indices = @transform_6, window_bounds = array<i64: 1, 128>}, {pipeline_mode = #tpu.pipeline_mode<synchronous>, transform_indices = @transform_7, window_bounds = array<i64: 4, 128>}, {pipeline_mode = #tpu.pipeline_mode<synchronous>, transform_indices = @transform_8, window_bounds = array<i64: 1, 128>}, {transform_indices = @transform_9, window_bounds = array<i64: 1, 128, 128>}, {transform_indices = @transform_10, window_bounds = array<i64: 1, 1, 128>}, {transform_indices = @transform_11, window_bounds = array<i64: 1, 128, 128>}, {transform_indices = @transform_12, window_bounds = array<i64: 1, 1, 128>}, {pipeline_mode = #tpu.pipeline_mode<synchronous>, transform_indices = @transform_13, window_bounds = array<i64: 128, 3>}, {pipeline_mode = #tpu.pipeline_mode<synchronous>, transform_indices = @transform_14, window_bounds = array<i64: 1, 3>}, {pipeline_mode = #tpu.pipeline_mode<synchronous>, transform_indices = @transform_15, window_bounds = array<i64: 2, 3>}, {pipeline_mode = #tpu.pipeline_mode<synchronous>, transform_indices = @transform_16, window_bounds = array<i64: 2, 128>}]} {
    %c0_i32 = arith.constant 0 : i32
    %0 = arith.cmpi eq, %arg0, %c0_i32 : i32
    %1 = arith.extui %0 : i1 to i32
    %c0_i32_0 = arith.constant 0 : i32
    %2 = arith.cmpi ne, %1, %c0_i32_0 : i32
    scf.if %2 {
      %c0_29 = arith.constant 0 : index
      %c0_30 = arith.constant 0 : index
      %39 = vector.load %arg1[%c0_29, %c0_30] : memref<16x8xbf16, #tpu.memory_space<vmem>>, vector<16x8xbf16>
      %c0_31 = arith.constant 0 : index
      %c0_32 = arith.constant 0 : index
      %40 = vector.load %arg6[%c0_31, %c0_32] : memref<8x128xbf16, #tpu.memory_space<vmem>>, vector<8x128xbf16>
      %cst_33 = arith.constant dense<0.000000e+00> : vector<16x128xf32>
      %41 = tpu.matmul %39, %40, %cst_33 {dimension_numbers = #tpu.dot_dimension_numbers<[1], [0], [0], [1], [0, 0, 1, 1], [], []>} : vector<16x8xbf16>, vector<8x128xbf16>, vector<16x128xf32> -> vector<16x128xf32>
      %c0_34 = arith.constant 0 : index
      %c0_35 = arith.constant 0 : index
      %42 = vector.load %arg7[%c0_34, %c0_35] : memref<1x128xf32, #tpu.memory_space<vmem>>, vector<1x128xf32>
      %43 = vector.broadcast %42 : vector<1x128xf32> to vector<16x128xf32>
      %44 = arith.addf %41, %43 : vector<16x128xf32>
      %c0_36 = arith.constant 0 : index
      %c0_37 = arith.constant 0 : index
      %45 = vector.load %arg18[%c0_36, %c0_37] : memref<16x128xf32, #tpu.memory_space<vmem>>, vector<16x128xf32>
      tpu.vector_store %arg18[%c0_36, %c0_37], %44 {strides = array<i32>} : memref<16x128xf32, #tpu.memory_space<vmem>>, vector<16x128xf32>,
      %c0_38 = arith.constant 0 : index
      %c0_39 = arith.constant 0 : index
      %46 = vector.load %arg2[%c0_38, %c0_39] : memref<32x4xbf16, #tpu.memory_space<vmem>>, vector<32x4xbf16>
      %c0_40 = arith.constant 0 : index
      %c0_41 = arith.constant 0 : index
      %47 = vector.load %arg8[%c0_40, %c0_41] : memref<4x128xbf16, #tpu.memory_space<vmem>>, vector<4x128xbf16>
      %cst_42 = arith.constant dense<0.000000e+00> : vector<32x128xf32>
      %48 = tpu.matmul %46, %47, %cst_42 {dimension_numbers = #tpu.dot_dimension_numbers<[1], [0], [0], [1], [0, 0, 1, 1], [], []>} : vector<32x4xbf16>, vector<4x128xbf16>, vector<32x128xf32> -> vector<32x128xf32>
      %c0_43 = arith.constant 0 : index
      %c0_44 = arith.constant 0 : index
      %49 = vector.load %arg9[%c0_43, %c0_44] : memref<1x128xf32, #tpu.memory_space<vmem>>, vector<1x128xf32>
      %50 = vector.broadcast %49 : vector<1x128xf32> to vector<32x128xf32>
      %51 = arith.addf %48, %50 : vector<32x128xf32>
      %c0_45 = arith.constant 0 : index
      %c0_46 = arith.constant 0 : index
      %52 = vector.load %arg19[%c0_45, %c0_46] : memref<32x128xf32, #tpu.memory_space<vmem>>, vector<32x128xf32>
      tpu.vector_store %arg19[%c0_45, %c0_46], %51 {strides = array<i32>} : memref<32x128xf32, #tpu.memory_space<vmem>>, vector<32x128xf32>,
    } else {
    }
    %c0 = arith.constant 0 : index
    %c0_1 = arith.constant 0 : index
    %3 = vector.load %arg18[%c0, %c0_1] : memref<16x128xf32, #tpu.memory_space<vmem>>, vector<16x128xf32>
    %c0_2 = arith.constant 0 : index
    %c0_3 = arith.constant 0 : index
    %4 = vector.load %arg3[%c0_2, %c0_3] : memref<32x16xbf16, #tpu.memory_space<vmem>>, vector<32x16xbf16>
    %5 = arith.truncf %3 : vector<16x128xf32> to vector<16x128xbf16>
    %cst = arith.constant dense<0.000000e+00> : vector<32x128xf32>
    %6 = tpu.matmul %4, %5, %cst {dimension_numbers = #tpu.dot_dimension_numbers<[1], [0], [0], [1], [0, 0, 1, 1], [], []>} : vector<32x16xbf16>, vector<16x128xbf16>, vector<32x128xf32> -> vector<32x128xf32>
    %c0_4 = arith.constant 0 : index
    %c0_5 = arith.constant 0 : index
    %7 = vector.load %arg19[%c0_4, %c0_5] : memref<32x128xf32, #tpu.memory_space<vmem>>, vector<32x128xf32>
    %8 = arith.addf %6, %7 : vector<32x128xf32>
    %cst_6 = arith.constant 0.000000e+00 : f32
    %9 = vector.broadcast %cst_6 : f32 to vector<32x128xf32>
    %10 = arith.maximumf %8, %9 : vector<32x128xf32>
    %c0_7 = arith.constant 0 : index
    %c0_8 = arith.constant 0 : index
    %11 = vector.load %arg4[%c0_7, %c0_8] : memref<16x32xbf16, #tpu.memory_space<vmem>>, vector<16x32xbf16>
    %12 = arith.truncf %10 : vector<32x128xf32> to vector<32x128xbf16>
    %cst_9 = arith.constant dense<0.000000e+00> : vector<16x128xf32>
    %13 = tpu.matmul %11, %12, %cst_9 {dimension_numbers = #tpu.dot_dimension_numbers<[1], [0], [0], [1], [0, 0, 1, 1], [], []>} : vector<16x32xbf16>, vector<32x128xbf16>, vector<16x128xf32> -> vector<16x128xf32>
    %14 = arith.addf %3, %13 : vector<16x128xf32>
    %15 = arith.truncf %14 : vector<16x128xf32> to vector<16x128xbf16>
    %c0_10 = arith.constant 0 : index
    %c0_11 = arith.constant 0 : index
    %c0_12 = arith.constant 0 : index
    %16 = vector.load %arg10[%c0_10, %c0_11, %c0_12] : memref<1x128x128xbf16, #tpu.memory_space<vmem>>, vector<1x128x128xbf16>
    %17 = vector.shape_cast %16 : vector<1x128x128xbf16> to vector<128x128xbf16>
    %cst_13 = arith.constant dense<0.000000e+00> : vector<16x128xf32>
    %18 = tpu.matmul %15, %17, %cst_13 {dimension_numbers = #tpu.dot_dimension_numbers<[1], [0], [0], [1], [0, 0, 1, 1], [], []>} : vector<16x128xbf16>, vector<128x128xbf16>, vector<16x128xf32> -> vector<16x128xf32>
    %c0_14 = arith.constant 0 : index
    %c0_15 = arith.constant 0 : index
    %c0_16 = arith.constant 0 : index
    %19 = vector.load %arg11[%c0_14, %c0_15, %c0_16] : memref<1x1x128xf32, #tpu.memory_space<vmem>>, vector<1x1x128xf32>
    %20 = vector.shape_cast %19 : vector<1x1x128xf32> to vector<1x128xf32>
    %21 = vector.broadcast %20 : vector<1x128xf32> to vector<16x128xf32>
    %22 = arith.addf %18, %21 : vector<16x128xf32>
    %cst_17 = arith.constant 0.000000e+00 : f32
    %23 = vector.broadcast %cst_17 : f32 to vector<16x128xf32>
    %24 = arith.maximumf %22, %23 : vector<16x128xf32>
    %25 = arith.truncf %24 : vector<16x128xf32> to vector<16x128xbf16>
    %c0_18 = arith.constant 0 : index
    %c0_19 = arith.constant 0 : index
    %c0_20 = arith.constant 0 : index
    %26 = vector.load %arg12[%c0_18, %c0_19, %c0_20] : memref<1x128x128xbf16, #tpu.memory_space<vmem>>, vector<1x128x128xbf16>
    %27 = vector.shape_cast %26 : vector<1x128x128xbf16> to vector<128x128xbf16>
    %cst_21 = arith.constant dense<0.000000e+00> : vector<16x128xf32>
    %28 = tpu.matmul %25, %27, %cst_21 {dimension_numbers = #tpu.dot_dimension_numbers<[1], [0], [0], [1], [0, 0, 1, 1], [], []>} : vector<16x128xbf16>, vector<128x128xbf16>, vector<16x128xf32> -> vector<16x128xf32>
    %c0_22 = arith.constant 0 : index
    %c0_23 = arith.constant 0 : index
    %c0_24 = arith.constant 0 : index
    %29 = vector.load %arg13[%c0_22, %c0_23, %c0_24] : memref<1x1x128xf32, #tpu.memory_space<vmem>>, vector<1x1x128xf32>
    %30 = vector.shape_cast %29 : vector<1x1x128xf32> to vector<1x128xf32>
    %31 = vector.broadcast %30 : vector<1x128xf32> to vector<16x128xf32>
    %32 = arith.addf %28, %31 : vector<16x128xf32>
    %cst_25 = arith.constant 0.000000e+00 : f32
    %33 = vector.broadcast %cst_25 : f32 to vector<16x128xf32>
    %34 = arith.maximumf %32, %33 : vector<16x128xf32>
    %c0_26 = arith.constant 0 : index
    %c0_27 = arith.constant 0 : index
    %35 = vector.load %arg18[%c0_26, %c0_27] : memref<16x128xf32, #tpu.memory_space<vmem>>, vector<16x128xf32>
    tpu.vector_store %arg18[%c0_26, %c0_27], %34 {strides = array<i32>} : memref<16x128xf32, #tpu.memory_space<vmem>>, vector<16x128xf32>,
    %c1_i32 = arith.constant 1 : i32
    %36 = arith.cmpi eq, %arg0, %c1_i32 : i32
    %37 = arith.extui %36 : i1 to i32
    %c0_i32_28 = arith.constant 0 : i32
    %38 = arith.cmpi ne, %37, %c0_i32_28 : i32
    scf.if %38 {
      %c0_29 = arith.constant 0 : index
      %c0_30 = arith.constant 0 : index
      %39 = vector.load %arg5[%c0_29, %c0_30] : memref<2x16xbf16, #tpu.memory_space<vmem>>, vector<2x16xbf16>
      %40 = arith.truncf %34 : vector<16x128xf32> to vector<16x128xbf16>
      %cst_31 = arith.constant dense<0.000000e+00> : vector<2x128xf32>
      %41 = tpu.matmul %39, %40, %cst_31 {dimension_numbers = #tpu.dot_dimension_numbers<[1], [0], [0], [1], [0, 0, 1, 1], [], []>} : vector<2x16xbf16>, vector<16x128xbf16>, vector<2x128xf32> -> vector<2x128xf32>
      %c0_32 = arith.constant 0 : index
      %c0_33 = arith.constant 0 : index
      %42 = vector.load %arg17[%c0_32, %c0_33] : memref<2x128xf32, #tpu.memory_space<vmem>>, vector<2x128xf32>
      tpu.vector_store %arg17[%c0_32, %c0_33], %41 {strides = array<i32>} : memref<2x128xf32, #tpu.memory_space<vmem>>, vector<2x128xf32>,
      %43 = arith.truncf %41 : vector<2x128xf32> to vector<2x128xbf16>
      %c0_34 = arith.constant 0 : index
      %c0_35 = arith.constant 0 : index
      %44 = vector.load %arg14[%c0_34, %c0_35] : memref<128x3xbf16, #tpu.memory_space<vmem>>, vector<128x3xbf16>
      %cst_36 = arith.constant dense<0.000000e+00> : vector<2x3xf32>
      %45 = tpu.matmul %43, %44, %cst_36 {dimension_numbers = #tpu.dot_dimension_numbers<[1], [0], [0], [1], [0, 0, 1, 1], [], []>} : vector<2x128xbf16>, vector<128x3xbf16>, vector<2x3xf32> -> vector<2x3xf32>
      %c0_37 = arith.constant 0 : index
      %c0_38 = arith.constant 0 : index
      %46 = vector.load %arg15[%c0_37, %c0_38] : memref<1x3xf32, #tpu.memory_space<vmem>>, vector<1x3xf32>
      %47 = vector.broadcast %46 : vector<1x3xf32> to vector<2x3xf32>
      %48 = arith.addf %45, %47 : vector<2x3xf32>
      %c0_39 = arith.constant 0 : index
      %c0_40 = arith.constant 0 : index
      %49 = vector.load %arg16[%c0_39, %c0_40] : memref<2x3xf32, #tpu.memory_space<vmem>>, vector<2x3xf32>
      tpu.vector_store %arg16[%c0_39, %c0_40], %48 {strides = array<i32>} : memref<2x3xf32, #tpu.memory_space<vmem>>, vector<2x3xf32>,
    } else {
    }
    return
  }
  func.func @transform_0(%arg0: i32) -> (i32, i32) {
    %c0_i32 = arith.constant 0 : i32
    %c0_i32_0 = arith.constant 0 : i32
    %c0_i32_1 = arith.constant 0 : i32
    return %c0_i32, %c0_i32_0 : i32, i32
  }
  func.func @transform_1(%arg0: i32) -> (i32, i32) {
    %c0_i32 = arith.constant 0 : i32
    %c0_i32_0 = arith.constant 0 : i32
    %c0_i32_1 = arith.constant 0 : i32
    return %c0_i32, %c0_i32_0 : i32, i32
  }
  func.func @transform_2(%arg0: i32) -> (i32, i32) {
    %c0_i32 = arith.constant 0 : i32
    %c0_i32_0 = arith.constant 0 : i32
    %c0_i32_1 = arith.constant 0 : i32
    return %c0_i32, %c0_i32_0 : i32, i32
  }
  func.func @transform_3(%arg0: i32) -> (i32, i32) {
    %c0_i32 = arith.constant 0 : i32
    %c0_i32_0 = arith.constant 0 : i32
    %c0_i32_1 = arith.constant 0 : i32
    return %c0_i32, %c0_i32_0 : i32, i32
  }
  func.func @transform_4(%arg0: i32) -> (i32, i32) {
    %c0_i32 = arith.constant 0 : i32
    %c0_i32_0 = arith.constant 0 : i32
    %c0_i32_1 = arith.constant 0 : i32
    return %c0_i32, %c0_i32_0 : i32, i32
  }
  func.func @transform_5(%arg0: i32) -> (i32, i32) {
    %c0_i32 = arith.constant 0 : i32
    %c0_i32_0 = arith.constant 0 : i32
    %c0_i32_1 = arith.constant 0 : i32
    return %c0_i32, %c0_i32_0 : i32, i32
  }
  func.func @transform_6(%arg0: i32) -> (i32, i32) {
    %c0_i32 = arith.constant 0 : i32
    %c0_i32_0 = arith.constant 0 : i32
    %c0_i32_1 = arith.constant 0 : i32
    return %c0_i32, %c0_i32_0 : i32, i32
  }
  func.func @transform_7(%arg0: i32) -> (i32, i32) {
    %c0_i32 = arith.constant 0 : i32
    %c0_i32_0 = arith.constant 0 : i32
    %c0_i32_1 = arith.constant 0 : i32
    return %c0_i32, %c0_i32_0 : i32, i32
  }
  func.func @transform_8(%arg0: i32) -> (i32, i32) {
    %c0_i32 = arith.constant 0 : i32
    %c0_i32_0 = arith.constant 0 : i32
    %c0_i32_1 = arith.constant 0 : i32
    return %c0_i32, %c0_i32_0 : i32, i32
  }
  func.func @transform_9(%arg0: i32) -> (i32, i32, i32) {
    %c0_i32 = arith.constant 0 : i32
    %c0_i32_0 = arith.constant 0 : i32
    %c0_i32_1 = arith.constant 0 : i32
    return %arg0, %c0_i32, %c0_i32_0 : i32, i32, i32
  }
  func.func @transform_10(%arg0: i32) -> (i32, i32, i32) {
    %c0_i32 = arith.constant 0 : i32
    %c0_i32_0 = arith.constant 0 : i32
    %c0_i32_1 = arith.constant 0 : i32
    return %arg0, %c0_i32, %c0_i32_0 : i32, i32, i32
  }
  func.func @transform_11(%arg0: i32) -> (i32, i32, i32) {
    %c0_i32 = arith.constant 0 : i32
    %c0_i32_0 = arith.constant 0 : i32
    %c0_i32_1 = arith.constant 0 : i32
    return %arg0, %c0_i32, %c0_i32_0 : i32, i32, i32
  }
  func.func @transform_12(%arg0: i32) -> (i32, i32, i32) {
    %c0_i32 = arith.constant 0 : i32
    %c0_i32_0 = arith.constant 0 : i32
    %c0_i32_1 = arith.constant 0 : i32
    return %arg0, %c0_i32, %c0_i32_0 : i32, i32, i32
  }
  func.func @transform_13(%arg0: i32) -> (i32, i32) {
    %c0_i32 = arith.constant 0 : i32
    %c0_i32_0 = arith.constant 0 : i32
    %c0_i32_1 = arith.constant 0 : i32
    return %c0_i32, %c0_i32_0 : i32, i32
  }
  func.func @transform_14(%arg0: i32) -> (i32, i32) {
    %c0_i32 = arith.constant 0 : i32
    %c0_i32_0 = arith.constant 0 : i32
    %c0_i32_1 = arith.constant 0 : i32
    return %c0_i32, %c0_i32_0 : i32, i32
  }
  func.func @transform_15(%arg0: i32) -> (i32, i32) {
    %c0_i32 = arith.constant 0 : i32
    %c0_i32_0 = arith.constant 0 : i32
    %c0_i32_1 = arith.constant 0 : i32
    return %c0_i32, %c0_i32_0 : i32, i32
  }
  func.func @transform_16(%arg0: i32) -> (i32, i32) {
    %c0_i32 = arith.constant 0 : i32
    %c0_i32_0 = arith.constant 0 : i32
    %c0_i32_1 = arith.constant 0 : i32
    return %c0_i32, %c0_i32_0 : i32, i32
  }
}

</mosaic_0001>

<bundles_post_ra>
// kernel: tpu_custom_call.1
= control target key start
LH: loop header
LB: loop body
LE: loop exit
PB: predicated region body
PF: predicated region fallthrough
CT: control target
= control target key end

     0   :  { %s2173_s0 = inlined_call_operand.vmem [shape: bf16[16,8], index: 0, kind: input, shape index: {}]   ;;  %s2174_s1 = inlined_call_operand.vmem [shape: bf16[32,4], index: 1, kind: input, shape index: {}]   ;;  %s2175_s2 = inlined_call_operand.vmem [shape: bf16[32,16], index: 2, kind: input, shape index: {}]   ;;  %s2176_s3 = inlined_call_operand.vmem [shape: bf16[16,32], index: 3, kind: input, shape index: {}]   ;;  %s2177_s4 = inlined_call_operand.vmem [shape: bf16[2,16], index: 4, kind: input, shape index: {}]   ;;  %s2178_s5 = inlined_call_operand.vmem [shape: bf16[8,128], index: 5, kind: input, shape index: {}]   ;;  %s2179_s6 = inlined_call_operand.vmem [shape: f32[1,128], index: 6, kind: input, shape index: {}]   ;;  %s2180_s7 = inlined_call_operand.vmem [shape: bf16[4,128], index: 7, kind: input, shape index: {}]   ;;  %s2181_s8 = inlined_call_operand.vmem [shape: f32[1,128], index: 8, kind: input, shape index: {}]   ;;  %s2182_s9 = inlined_call_operand.vmem [shape: bf16[2,128,128], index: 9, kind: input, shape index: {}]   ;;  %s2183_s10 = inlined_call_operand.vmem [shape: f32[2,1,128], index: 10, kind: input, shape index: {}]   ;;  %s2184_s11 = inlined_call_operand.hbm [shape: bf16[2,128,128], index: 11, kind: input, shape index: {}]   ;;  %s2185_s12 = inlined_call_operand.vmem [shape: f32[2,1,128], index: 12, kind: input, shape index: {}]   ;;  %s2186_s13 = inlined_call_operand.vmem [shape: bf16[128,3], index: 13, kind: input, shape index: {}]   ;;  %s2187_s14 = inlined_call_operand.vmem [shape: f32[1,3], index: 14, kind: input, shape index: {}]   ;;  %s2188_s15 = inlined_call_operand.hbm [shape: f32[2,3], index: 15, kind: output, shape index: {0}]   ;;  %s2189_s16 = inlined_call_operand.hbm [shape: f32[2,128], index: 16, kind: output, shape index: {1}]  }
   0x1   :  { %2194 = sst [smem:[#allocation17_spill]] %s2173_s0 }
   0x2   :  { %2195 = sst [smem:[#allocation18_spill]] %s2184_s11 }
   0x3   :  { %22 = vsyncpa [#allocation5], 0 }
   0x4   :  { %24 = vsyncpa [#allocation5 + $0x1], 0 }
   0x5   :  { %25 = vsyncpa [#allocation6], 0 }
   0x6   :  { %26 = vsyncpa [#allocation9], 0  ;;  %s1882_s21 = smov 0   ;;  %s1884_s22 = smov 0  }
   0x7   :  { %s1886_s23 = smov 0   ;;  %s1888_s24 = smov 0  }
   0x8 LB: > { %2196 = sst [smem:[#allocation13_spill]] %s1776_s22  ;;  %s1901_s25 = sadd.s32 4294967295, %s1784_s24   ;;  %s1784_s24 = sphi %s1888_s24, %s2205_s24   ;;  %s1780_s23 = sphi %s1886_s23, %s2208_s23   ;;  %s1776_s22 = sphi %s1884_s22, %s2207_s22   ;;  %s1772_s21 = sphi %s1882_s21, %s2206_s21  }
   0x9   : > { %2197 = sst [smem:[#allocation14_spill]] %s1780_s23  ;;  %s1904_s26 = sadd.s32 1, %s1784_s24  }
   0xa   : > { %2198 = sst [smem:[#allocation15_spill]] %s1904_s26  ;;  %s277_s27 = ssub.s32 %s1784_s24, %s1904_s26 }
   0xb   : > { %s280_s28 = sadd.s32 1, %s1780_s23  ;;  %p278_p0 = scmp.eq.s32.totalorder %s277_s27, 0 }
   0xc   : > { %p287_p1 = scmp.ne.s32.totalorder %s1780_s23, %s1776_s22  ;;  %p288_p2 = scmp.eq.s32.totalorder %s1784_s24, 0 }
   0xd   : > { %p293_p3 = scmp.ne.s32.totalorder %s1776_s22, %s1772_s21  ;;  %p294_p5 = scmp.eq.s32.totalorder %s1901_s25, 0 }
   0xe   : > { %s1914_s29 = scalar_select %p278_p0, %s1780_s23, %s280_s28  }
   0xf   : > { %p289_p4 = por %p288_p2, %p287_p1  ;;  %p1583_p6 = scmp.lt.s32.totalorder %s1784_s24, 2 }
  0x10   : > { %2199 = sst [smem:[#allocation16_spill]] %s1914_s29  ;;  %p1918_p7 = por %p294_p5, %p293_p3 }
  0x11   : > { %s474_s0 = sand.u32 1, %s1780_s23   ;;  %s1434_s18 = sshll.u32 %s1784_s24, 10 }
  0x12   : > { %s1377_s17 = sshll.u32 %s474_s0, 6  ;;  %s2201_s11 = sld [smem:[#allocation18_spill]] }
  0x13   : > { %s478_s21 = scalar_lea.vmem [#allocation4], %s1377_s17  ;;  %p1931_p8 = pnand %p1583_p6, %p289_p4 }
  0x14   : > { %s485_s28 = sshll.u32 %s478_s21, 4  ;;  %s1936_s23 = scalar_lea.sflag [#allocation5], %s474_s0  ;;  %s1929_s28 = int_to_ptr.vmem [resolvable:$true] %s485_s28 }
  0x15   : > { %p1662_p11 = pneg %p1931_p8 }
  0x18   : > { %s1927_s27 = scalar_lea.hbm %s2201_s11, %s1434_s18  ;;  %s1665_s20 = scalar_lea.hbm %s2201_s11, 2048 }
  0x19   : > { %s1660_s19 = scalar_lea.hbm %s1927_s27, 1024  ;;  %p1666_p0 = scmp.lt.u32.totalorder %s1927_s27, %s2201_s11 }
  0x1a   : > { %p1661_p10 = scmp.ne.s32.totalorder %s1927_s27, %s1660_s19  ;;  %p1667_p1 = scmp.lt.u32.totalorder %s1665_s20, %s1660_s19 }
  0x1b   : > { %p1669_p3 = scmp.lt.u32.totalorder %s1660_s19, %s1927_s27 }
  0x1c   : > { %p1663_p12 = pnand %p1662_p11, %p1661_p10  ;;  %p1668_p2 = por %p1667_p1, %p1666_p0 }
  0x1e   : > { %p1664_p13 = pneg %p1663_p12  ;;  %p1670_p4 = por %p1669_p3, %p1668_p2 }
  0x20   : > { %p1671_p5 = pnand %p1670_p4, %p1664_p13 }
  0x22   : > { %1674 = shalt.err (!%p1671_p5)
}
  0x23   : > { %s1675_s0 = scalar_lea.vmem %s1929_s28, 1024  ;;  %s1786_s17 = smov [#allocation4]  }
  0x24   : > { %p1676_p6 = scmp.ne.s32.totalorder %s1929_s28, %s1675_s0  ;;  %s1680_s18 = sshll.u32 %s1786_s17, 4  ;;  %s1681_s18 = int_to_ptr.vmem [resolvable:$false] %s1680_s18 }
  0x25   : > { %s1682_s26 = scalar_lea.vmem %s1681_s18, 2048  ;;  %p1683_p9 = scmp.lt.s32.totalorder %s1929_s28, %s1681_s18 }
  0x26   : > { %p1678_p10 = pnand %p1676_p6, %p1662_p11  ;;  %p1684_p0 = scmp.lt.s32.totalorder %s1682_s26, %s1675_s0 }
  0x28   : > { %p1679_p12 = pneg %p1678_p10  ;;  %p1685_p1 = por %p1684_p0, %p1683_p9 }
  0x2a   : > { %p1686_p2 = pnand %p1685_p1, %p1679_p12 }
  0x2c   : > { %1689 = shalt.err (!%p1686_p2)
}
  0x2d   : > { %s1787_s19 = smov 64   ;;  %s1788_s20 = smov 4  }
  0x2e   : > { %1582 = dma.hbm_to_vmem [thread:$0]  (!%p1931_p8), %s1927_s27, 1024, %s1929_s28, %s1936_s23, %s1787_s19, %s1787_s19, %s1788_s20  }
  0x2f   : > { %p499_p11 = scmp.lt.s32.totalorder %s1784_s24, 3  ;;  %p2203_p13 = scmp.ge.s32.totalorder %s1784_s24, 1 }
  0x31   : > { %p500_p3 = pnand %p2203_p13, %p499_p11 }
  0x32   : > { %s505_s21 = sand.u32 (!%p500_p3), 1, %s1776_s22  }
  0x33   : > { %503 = sbr.rel (%p500_p3) target bundleno = 1665 (0x681), region = 80  ;;  %s1381_s0 = sshll.u32 (!%p500_p3), %s505_s21, 6 }
  0x34   : > { %s506_s17 = scalar_lea.sflag (!%p500_p3), [#allocation5], %s505_s21  ;;  %s1968_s18 = scalar_lea.vmem (!%p500_p3), [#allocation4], %s1381_s0 }
  0x3a   : > { %1759 = dma.done.wait (%p1918_p7), %s506_s17, 1024  }
  0x3b   : > { %1761 = vsyncadd (%p1918_p7), %s506_s17, 4294966272  ;;  %p564_p9 = scmp.lt.s32.totalorder %s1901_s25, 1  ;;  %p1384_p7 = scmp.ne.s32.totalorder %s1901_s25, 0 }
  0x3c   : > { %v650_v0 = vld [vmem:[%s2180_s7] sm:$0x3] (!%p1384_p7)  ;;  %vm675_vm0 = vcmask (!%p1384_p7), 1041408   ;;  %v1789_v2 = vmov (!%p1384_p7), 0.0   ;;  %vm599_vm1 = vcmask (!%p1384_p7), 1043456   ;;  %vm1790_vm2 = vmmov (!%p1384_p7), 0  }
  0x3d   : > { %s1976_s23 = scalar_select %p564_p9, %s1901_s25, 1 }
  0x3e   : > { %579 = sbr.rel (%p1384_p7) target bundleno = 286 (0x11e), region = 88  ;;  %v582_v1 = vld [vmem:[%s2178_s5] sm:$0xf] (!%p1384_p7)  ;;  %1476 = vmatprep.subr.bf16.mxu0 (!%p1384_p7), %v1789_v2  ;;  %1568 = vmatprep.subr.msk.bf16.mxu1 (!%p1384_p7), %vm675_vm0, %v650_v0  ;;  %v677_v3 = vsel (!%p1384_p7), %vm675_vm0, %v650_v0, 0  ;;  %vm668_vm3 = vcmask (!%p1384_p7), 31744   ;;  %s2204_s22 = sld [smem:[#allocation17_spill]] (!%p1384_p7) }
  0x3f   : > { %s1435_s24 = sshll.u32 %s1976_s23, 6  ;;  %s571_s28 = scalar_lea.vmem %s2183_s10, %s1976_s23  ;;  %v1630_v4 = vld [vmem:[%s2174_s1] sm:$0xff] (!%p1384_p7)   ;;  %v601_v5 = vsel (!%p1384_p7), %vm599_vm1, %v582_v1, 0  ;;  %1483 = vmatpush3.bf16.msra.mxu1 (!%p1384_p7), %v677_v3  ;;  %1478 = vmatprep.mubr.msk.bf16.mxu0 (!%p1384_p7), %vm1790_vm2, %v1789_v2  ;;  %vm595_vm4 = vcmask (!%p1384_p7), 64512   ;;  %v1632_v7 = vld [vmem:[%s2174_s1 + $0x8] sm:$0xff] (!%p1384_p7)  }
  0x40   : > { %s1986_s20 = scalar_lea.vmem %s2182_s9, %s1435_s24  ;;  %s574_s0 = scalar_lea.vmem %s2185_s12, %s1976_s23  ;;  %1477 = vmatpush3.bf16.msra.mxu0 (!%p1384_p7), %v601_v5  ;;  %1484 = vmatprep.mubr.msk.bf16.mxu1 (!%p1384_p7), %vm668_vm3, %v1630_v4  ;;  %v1385_v8 = vld [vmem:[%s2179_s6] ss:$0 sm:$0xff] (!%p1384_p7) }
  0x41   : > { %v1388_v9 = vld [vmem:[%s2181_s8] ss:$0 sm:$0xff] (!%p1384_p7) }
  0x42   : > { %1485 = vmatmul.mubr.msk.bf16.vlgmr.msra.gmra.mrb[0].mxu1 (!%p1384_p7), %vm668_vm3, %v1632_v7 }
  0x44   : > { %v1631_v6 = vld [vmem:[%s2204_s22] sm:$0xff] (!%p1384_p7)  }
  0x45   : > { %1479 = vmatmul.mubr.msk.bf16.vlgmr.msra.gmra.mrb[0].mxu0 %vm595_vm4, %v1631_v6 }
 0x115   : > { %v1486_v11 = vpop.f32.mrb[0].mxu1 }
 0x116   : > { %v722_v13 = vadd.f32 %v1486_v11, %v1388_v9  ;;  %v713_v15 = vpop.f32.mrb[1].mxu1 }
 0x117   : > { %v714_v16 = vadd.f32 %v1388_v9, %v713_v15  ;;  %v1487_v18 = vpop.f32.mrb[2].mxu1 }
 0x118   : > { %v637_v10 = vpop.f32.mrb[0].mxu0  ;;  %730 = vst [vmem:[#allocation3 + $0x10] sm:$0xff] %v722_v13  ;;  %v725_v20 = vadd.f32 %v1487_v18, %v1388_v9  ;;  %v716_v22 = vpop.f32.mrb[3].mxu1 }
 0x119   : > { %v638_v12 = vadd.f32 %v1385_v8, %v637_v10  ;;  %v1480_v14 = vpop.f32.mrb[1].mxu0  ;;  %728 = vst [vmem:[#allocation3] sm:$0xff] %v714_v16  ;;  %v717_v23 = vadd.f32 %v1388_v9, %v716_v22 }
 0x11a   : > { %v640_v17 = vpop.f32.mrb[2].mxu0  ;;  %731 = vst [vmem:[#allocation3 + $0x18] sm:$0xff] %v725_v20 }
 0x11b   : > { %644 = vst [vmem:[#allocation2] sm:$0xff] %v638_v12  ;;  %v641_v19 = vadd.f32 %v1385_v8, %v640_v17  ;;  %v1481_v21 = vpop.f32.mrb[3].mxu0  ;;  %729 = vst [vmem:[#allocation3 + $0x8] sm:$0xff] %v717_v23 }
 0x11d   : > { %645 = vst [vmem:[#allocation2 + $0x8] sm:$0xff] %v641_v19 }
 0x11e PF: > { %vm753_vm5 = vcmask 130048   ;;  %v1633_v27 = vld [vmem:[%s2175_s2] sm:$0xff]   ;;  %v1634_v28 = vld [vmem:[%s2175_s2 + $0x8] sm:$0xff]   ;;  %v1791_v29 = vmov 0.0   ;;  %vm1792_vm6 = vmmov 0   ;;  %v1638_v32 = vld [vmem:[%s1986_s20 + $0x10] sm:$0xff]  }
 0x11f   : > { %1490 = vmatprep.mubr.msk.bf16.mxu0 %vm753_vm5, %v1633_v27  ;;  %1494 = vmatprep.subr.bf16.mxu1 %v1791_v29  ;;  %v1636_v30 = vld [vmem:[%s1986_s20] sm:$0xff]   ;;  %v1637_v31 = vld [vmem:[%s1986_s20 + $0x8] sm:$0xff]   ;;  %v1639_v33 = vld [vmem:[%s1986_s20 + $0x18] sm:$0xff]   ;;  %vm822_vm7 = vcmask 261120   ;;  %p1417_p8 = scmp.ne.s32.totalorder %s1901_s25, 1 }
 0x120   : > { %1498 = vmatprep.mubr.msk.bf16.mxu1 %vm1792_vm6, %v1791_v29  ;;  %v1640_v34 = vld [vmem:[%s1986_s20 + $0x20] sm:$0xff]   ;;  %v1641_v35 = vld [vmem:[%s1986_s20 + $0x28] sm:$0xff]   ;;  %v739_v37 = vld [vmem:[#allocation3] sm:$0xff]  ;;  %vm1794_vm8 = vmmov (!%p1417_p8), 0   ;;  %vm1263_vm9 = vcmask (!%p1417_p8), 17408  }
 0x121   : > { %v741_v36 = vld [vmem:[#allocation3 + $0x10] sm:$0xff]  ;;  %v742_v39 = vld [vmem:[#allocation3 + $0x18] sm:$0xff]  ;;  %v1642_v55 = vld [vmem:[%s1986_s20 + $0x30] sm:$0xff]  }
 0x122   : > { %v2014_v24 = vld [vmem:[#allocation2] sm:$0xff]  ;;  %v740_v42 = vld [vmem:[#allocation3 + $0x8] sm:$0xff]  ;;  %v1644_v57 = vld [vmem:[%s1968_s18] sm:$0xff]  }
 0x123   : > { %v1635_v54 = vld [vmem:[%s2176_s3] sm:$0xff]   ;;  %v1643_v56 = vld [vmem:[%s1986_s20 + $0x38] sm:$0xff]   ;;  %v1647_v60 = vld [vmem:[%s1968_s18 + $0x18] sm:$0xff]  }
 0x124   : > { %v2016_v25 = vld [vmem:[#allocation2 + $0x8] sm:$0xff]  ;;  %v1645_v58 = vld [vmem:[%s1968_s18 + $0x8] sm:$0xff]   ;;  %v1646_v59 = vld [vmem:[%s1968_s18 + $0x10] sm:$0xff]  }
 0x125   : > { %v738_v26 = vpack.c.bf16 %v2016_v25, %v2014_v24  ;;  %v1648_v61 = vld [vmem:[%s1968_s18 + $0x20] sm:$0xff]   ;;  %v1649_v62 = vld [vmem:[%s1968_s18 + $0x28] sm:$0xff]   ;;  %v1650_v6 = vld [vmem:[%s1968_s18 + $0x30] sm:$0xff]  }
 0x126   : > { %v1651_v7 = vld [vmem:[%s1968_s18 + $0x38] sm:$0xff]   ;;  %v1399_v8 = vld [vmem:[%s571_s28] ss:$0 sm:$0xff] }
 0x127   : > { %1488 = vmatprep.subr.bf16.mxu0 %v738_v26  ;;  %v1408_v18 = vld [vmem:[%s574_s0] ss:$0 sm:$0xff] }
 0x128   : > { %1489 = vmatpush3.bf16.msra.mxu0 %v738_v26 }
 0x129   : > { %1502 = vmatprep.subr.bf16.mxu0 %v1791_v29 }
 0x12b   : > { %1491 = vmatmul.mubr.msk.bf16.vlgmr.msra.gmra.mrb[0].mxu0 %vm753_vm5, %v1634_v28  ;;  %v1793_v28 = vmov (!%p1417_p8), 0.0  }
 0x12c   : > { %1518 = vmatprep.mubr.msk.bf16.mxu0 %vm1792_vm6, %v1791_v29  ;;  %1503 = vmatpush3.bf16.msra.mxu0 %v1636_v30  ;;  %v1105_v30 = vld [vmem:[%s2177_s4] sm:$0x1] (!%p1417_p8) }
 0x12d   : > { %1504 = vmatprep.subr.bf16.mxu0 %v1791_v29 }
 0x130   : > { %1505 = vmatpush3.bf16.msra.mxu0 %v1637_v31  ;;  %v1653_v31 = vld [vmem:[%s2186_s13 + $0x8] sm:$0xff] (!%p1417_p8)  }
 0x131   : > { %1506 = vmatprep.subr.bf16.mxu0 %v1791_v29 }
 0x134   : > { %1507 = vmatpush3.bf16.msra.mxu0 %v1638_v32  ;;  %v1654_v32 = vld [vmem:[%s2186_s13 + $0x10] sm:$0xff] (!%p1417_p8)  }
 0x135   : > { %1508 = vmatprep.subr.bf16.mxu0 %v1791_v29 }
 0x138   : > { %1509 = vmatpush3.bf16.msra.mxu0 %v1639_v33  ;;  %v1655_v33 = vld [vmem:[%s2186_s13 + $0x18] sm:$0xff] (!%p1417_p8)  }
 0x139   : > { %1510 = vmatprep.subr.bf16.mxu0 %v1791_v29 }
 0x13c   : > { %1511 = vmatpush3.bf16.msra.mxu0 %v1640_v34  ;;  %v1656_v34 = vld [vmem:[%s2186_s13 + $0x20] sm:$0xff] (!%p1417_p8)  }
 0x13d   : > { %1512 = vmatprep.subr.bf16.mxu0 %v1791_v29 }
 0x140   : > { %1513 = vmatpush3.bf16.msra.mxu0 %v1641_v35  ;;  %v1657_v35 = vld [vmem:[%s2186_s13 + $0x28] sm:$0xff] (!%p1417_p8)  }
 0x141   : > { %1514 = vmatprep.subr.bf16.mxu0 %v1791_v29 }
 0x144   : > { %1515 = vmatpush3.bf16.msra.mxu0 %v1642_v55 }
 0x145   : > { %1516 = vmatprep.subr.bf16.mxu0 %v1791_v29 }
 0x148   : > { %1517 = vmatpush3.bf16.msra.mxu0 %v1643_v56 }
 0x149   : > { %1542 = vmatprep.subr.bf16.mxu0 (!%p1417_p8), %v1793_v28 }
 0x1fe   : > { %v1492_v38 = vpop.f32.mrb[0].mxu0 }
 0x1ff   : > { %v803_v40 = vadd.f32 %v1492_v38, %v741_v36  ;;  %v794_v41 = vpop.f32.mrb[1].mxu0  ;;  %v1658_v36 = vld [vmem:[%s2186_s13 + $0x30] sm:$0xff] (!%p1417_p8)  }
 0x200   : > { %v795_v43 = vadd.f32 %v794_v41, %v739_v37  ;;  %v1493_v44 = vpop.f32.mrb[2].mxu0  ;;  %v1659_v37 = vld [vmem:[%s2186_s13 + $0x38] sm:$0xff] (!%p1417_p8)  }
 0x201   : > { %v806_v45 = vadd.f32 %v1493_v44, %v742_v39  ;;  %v797_v46 = vpop.f32.mrb[3].mxu0  ;;  %v811_v48 = vmax.f32 %v803_v40, 0.0 }
 0x202   : > { %v798_v47 = vadd.f32 %v797_v46, %v740_v42  ;;  %v809_v50 = vmax.f32 %v795_v43, 0.0  ;;  %v1419_v43 = vld [vmem:[%s2187_s14] ss:$0 sm:$0xff] (!%p1417_p8) }
 0x203   : > { %v812_v49 = vmax.f32 %v806_v45, 0.0 }
 0x204   : > { %v810_v51 = vmax.f32 %v798_v47, 0.0 }
 0x205   : > { %v816_v52 = vpack.c.bf16 %v812_v49, %v811_v48 }
 0x206   : > { %v815_v53 = vpack.c.bf16 %v810_v51, %v809_v50 }
 0x208   : > { %1495 = vmatpush3.bf16.msra.mxu1 %v815_v53 }
 0x209   : > { %1496 = vmatprep.subr.bf16.mxu1 %v1791_v29 }
 0x20c   : > { %1497 = vmatpush3.bf16.msra.mxu1 %v816_v52 }
 0x20d   : > { %1522 = vmatprep.subr.bf16.mxu1 %v1791_v29 }
 0x20f   : > { %1499 = vmatmul.mubr.msk.bf16.vlgmr.msra.gmra.mrb[0].mxu1 %vm822_vm7, %v1635_v54 }
 0x210   : > { %1538 = vmatprep.mubr.msk.bf16.mxu1 %vm1792_vm6, %v1791_v29  ;;  %1523 = vmatpush3.bf16.msra.mxu1 %v1644_v57 }
 0x211   : > { %1524 = vmatprep.subr.bf16.mxu1 %v1791_v29 }
 0x214   : > { %1525 = vmatpush3.bf16.msra.mxu1 %v1645_v58 }
 0x215   : > { %1526 = vmatprep.subr.bf16.mxu1 %v1791_v29 }
 0x218   : > { %1527 = vmatpush3.bf16.msra.mxu1 %v1646_v59 }
 0x219   : > { %1528 = vmatprep.subr.bf16.mxu1 %v1791_v29 }
 0x21c   : > { %1529 = vmatpush3.bf16.msra.mxu1 %v1647_v60 }
 0x21d   : > { %1530 = vmatprep.subr.bf16.mxu1 %v1791_v29 }
 0x220   : > { %1531 = vmatpush3.bf16.msra.mxu1 %v1648_v61 }
 0x221   : > { %1532 = vmatprep.subr.bf16.mxu1 %v1791_v29 }
 0x224   : > { %1533 = vmatpush3.bf16.msra.mxu1 %v1649_v62 }
 0x225   : > { %1534 = vmatprep.subr.bf16.mxu1 %v1791_v29 }
 0x228   : > { %1535 = vmatpush3.bf16.msra.mxu1 %v1650_v6 }
 0x229   : > { %1536 = vmatprep.subr.bf16.mxu1 %v1791_v29  ;;  %v1652_v29 = vld [vmem:[%s2186_s13] sm:$0xff] (!%p1417_p8)  }
 0x22c   : > { %1537 = vmatpush3.bf16.msra.mxu1 %v1651_v7 }
 0x22d   : > { %1548 = vmatprep.subr.bf16.mxu1 (!%p1417_p8), %v1793_v28 }
 0x2e2   : > { %v860_v63 = vpop.f32.mrb[0].mxu1 }
 0x2e3   : > { %v1500_v0 = vpop.f32.mrb[1].mxu1  ;;  %v867_v2 = vadd.f32 %v860_v63, %v2014_v24 }
 0x2e4   : > { %v863_v1 = vpop.f32.mrb[2].mxu1 }
 0x2e5   : > { %v868_v3 = vadd.f32 %v863_v1, %v2016_v25  ;;  %v1501_v4 = vpop.f32.mrb[3].mxu1 }
 0x2e7   : > { %v869_v5 = vpack.c.bf16 %v868_v3, %v867_v2 }
 0x2e9   : > { %1519 = vmatmul.mubr.bf16.vlgmr.msra.gmra.mrb[4].mxu0 %v869_v5 }
 0x2ea   : > { %1544 = vmatprep.mubr.msk.bf16.mxu0 (!%p1417_p8), %vm1794_vm8, %v1793_v28 }
 0x3bc   : > { %v975_v9 = vpop.f32.mrb[4].mxu0 }
 0x3bd   : > { %v976_v10 = vadd.f32 %v1399_v8, %v975_v9  ;;  %v1520_v11 = vpop.f32.mrb[5].mxu0 }
 0x3be   : > { %v978_v12 = vpop.f32.mrb[6].mxu0 }
 0x3bf   : > { %v979_v13 = vadd.f32 %v1399_v8, %v978_v12  ;;  %v1521_v14 = vpop.f32.mrb[7].mxu0  ;;  %v982_v15 = vmax.f32 %v976_v10, 0.0 }
 0x3c1   : > { %v983_v16 = vmax.f32 %v979_v13, 0.0 }
 0x3c3   : > { %v984_v17 = vpack.c.bf16 %v983_v16, %v982_v15 }
 0x3c5   : > { %1539 = vmatmul.mubr.bf16.vlgmr.msra.gmra.mrb[4].mxu1 %v984_v17 }
 0x3c6   : > { %1549 = vmatpush3.bf16.msra.mxu1 (!%p1417_p8), %v1652_v29  ;;  %1564 = vmatprep.mubr.msk.bf16.mxu1 (!%p1417_p8), %vm1794_vm8, %v1793_v28 }
 0x3c7   : > { %1550 = vmatprep.subr.bf16.mxu1 (!%p1417_p8), %v1793_v28 }
 0x3ca   : > { %1551 = vmatpush3.bf16.msra.mxu1 (!%p1417_p8), %v1653_v31 }
 0x3cb   : > { %1552 = vmatprep.subr.bf16.mxu1 (!%p1417_p8), %v1793_v28 }
 0x3ce   : > { %1553 = vmatpush3.bf16.msra.mxu1 (!%p1417_p8), %v1654_v32 }
 0x3cf   : > { %1554 = vmatprep.subr.bf16.mxu1 (!%p1417_p8), %v1793_v28 }
 0x3d2   : > { %1555 = vmatpush3.bf16.msra.mxu1 (!%p1417_p8), %v1655_v33 }
 0x3d3   : > { %1556 = vmatprep.subr.bf16.mxu1 (!%p1417_p8), %v1793_v28 }
 0x3d6   : > { %1557 = vmatpush3.bf16.msra.mxu1 (!%p1417_p8), %v1656_v34 }
 0x3d7   : > { %1558 = vmatprep.subr.bf16.mxu1 (!%p1417_p8), %v1793_v28 }
 0x3da   : > { %1559 = vmatpush3.bf16.msra.mxu1 (!%p1417_p8), %v1657_v35 }
 0x3db   : > { %1560 = vmatprep.subr.bf16.mxu1 (!%p1417_p8), %v1793_v28 }
 0x3de   : > { %1561 = vmatpush3.bf16.msra.mxu1 (!%p1417_p8), %v1658_v36 }
 0x3df   : > { %1562 = vmatprep.subr.bf16.mxu1 (!%p1417_p8), %v1793_v28 }
 0x3e2   : > { %1563 = vmatpush3.bf16.msra.mxu1 (!%p1417_p8), %v1659_v37 }
 0x498   : > { %v1090_v19 = vpop.f32.mrb[4].mxu1 }
 0x499   : > { %v1091_v20 = vadd.f32 %v1408_v18, %v1090_v19  ;;  %v1540_v21 = vpop.f32.mrb[5].mxu1  ;;  %1104 = sbr.rel (%p1417_p8) target bundleno = 1617 (0x651), region = 92 }
 0x49a   : > { %v1093_v22 = vpop.f32.mrb[6].mxu1 }
 0x49b   : > { %v1097_v23 = vmax.f32 %v1091_v20, 0.0  ;;  %v1094_v24 = vadd.f32 %v1408_v18, %v1093_v22  ;;  %v1541_v25 = vpop.f32.mrb[7].mxu1 }
 0x49d   : > { %1099 = vst [vmem:[#allocation2] sm:$0xff] %v1097_v23  ;;  %v1098_v26 = vmax.f32 %v1094_v24, 0.0 }
 0x49f   : > { %1100 = vst [vmem:[#allocation2 + $0x8] sm:$0xff] %v1098_v26  ;;  %v1106_v27 = vpack.c.bf16 (!%p1417_p8), %v1098_v26, %v1097_v23 }
 0x4a1   : > { %1543 = vmatpush3.bf16.msra.mxu0 %v1106_v27 }
 0x4a4   : > { %1545 = vmatmul.mubr.msk.bf16.vlgmr.msra.gmra.mrb[0].mxu0 %vm753_vm5, %v1105_v30 }
 0x577   : > { %v1144_v38 = vpop.f32.mrb[0].mxu0 }
 0x578   : > { %1150 = vst [vmem:[#allocation8] sm:$0x3] %v1144_v38  ;;  %v1151_v39 = vpack.c.bf16 %v1144_v38, %v1144_v38  ;;  %v1546_v40 = vpop.f32.mrb[1].mxu0 }
 0x579   : > { %v1147_v41 = vpop.f32.mrb[2].mxu0 }
 0x57a   : > { %v1547_v42 = vpop.f32.mrb[3].mxu0  ;;  %1565 = vmatmul.mubr.bf16.vlgmr.msra.gmra.mrb[0].mxu1 %v1151_v39 }
 0x64d   : > { %v1257_v44 = vpop.f32.mrb[0].mxu1 }
 0x64e   : > { %v1258_v45 = vadd.f32 %v1419_v43, %v1257_v44  ;;  %v1566_v46 = vpop.f32.mrb[1].mxu1 }
 0x64f   : > { %v1260_v47 = vpop.f32.mrb[2].mxu1 }
 0x650   : > { %1264 = vst.msk [vmem:[#allocation7] sm:$0x3] %vm1263_vm9, %v1258_v45  ;;  %v1567_v48 = vpop.f32.mrb[3].mxu1 }
 0x651 PF: > { %p1584_p4 = scmp.eq.s32.totalorder %s1901_s25, 1  ;;  %s1795_s27 = smov [#allocation7]  }
 0x652   : > { %s1272_s11 = sshll.u32 %s1795_s27, 4  ;;  %s1796_s26 = smov [#allocation8]   ;;  %s1273_s11 = int_to_ptr.vmem [resolvable:$true] %s1272_s11 }
 0x653   : > { %s1283_s22 = sshll.u32 %s1796_s26, 4  ;;  %s1690_s19 = scalar_lea.vmem %s1273_s11, 32  ;;  %s1284_s22 = int_to_ptr.vmem [resolvable:$true] %s1283_s22 }
 0x654   : > { %p1691_p5 = scmp.ne.s32.totalorder %s1273_s11, %s1690_s19  ;;  %p1697_p12 = scmp.lt.s32.totalorder %s1273_s11, %s1273_s11 }
 0x655   : > { %p1698_p0 = scmp.lt.s32.totalorder %s1690_s19, %s1690_s19 }
 0x656   : > { %p1692_p6 = pnand %p1691_p5, %p1584_p4 }
 0x657   : > { %p1699_p1 = por %p1698_p0, %p1697_p12 }
 0x658   : > { %p1693_p10 = pneg %p1692_p6 }
 0x65a   : > { %p1700_p2 = pnand %p1699_p1, %p1693_p10 }
 0x65c   : > { %1703 = shalt.err (!%p1700_p2)
}
 0x65d   : > { %s1704_s21 = scalar_lea.hbm %s2188_s15, 32 }
 0x65e   : > { %p1705_p11 = scmp.ne.s32.totalorder %s2188_s15, %s1704_s21  ;;  %p1710_p9 = scmp.lt.u32.totalorder %s1704_s21, %s2188_s15 }
 0x660   : > { %p1706_p13 = pnand %p1705_p11, %p1584_p4 }
 0x662   : > { %p1707_p3 = pneg %p1706_p13 }
 0x664   : > { %p1712_p7 = pnand %p1710_p9, %p1707_p3 }
 0x666   : > { %1715 = shalt.err (!%p1712_p7)
}
 0x667   : > { %1572 = dma.vmem_to_hbm [thread:$0]  (%p1584_p4), %s1273_s11, 32, %s2188_s15, [#allocation6]  }
 0x668   : > { %s1716_s24 = scalar_lea.vmem %s1284_s22, 32  ;;  %p1723_p10 = scmp.lt.s32.totalorder %s1284_s22, %s1284_s22 }
 0x669   : > { %p1717_p8 = scmp.ne.s32.totalorder %s1284_s22, %s1716_s24  ;;  %p1724_p12 = scmp.lt.s32.totalorder %s1716_s24, %s1716_s24 }
 0x66b   : > { %p1718_p5 = pnand %p1717_p8, %p1584_p4  ;;  %p1725_p0 = por %p1724_p12, %p1723_p10 }
 0x66d   : > { %p1719_p6 = pneg %p1718_p5 }
 0x66f   : > { %p1726_p1 = pnand %p1725_p0, %p1719_p6 }
 0x671   : > { %1729 = shalt.err (!%p1726_p1)
}
 0x672   : > { %s1730_s19 = scalar_lea.hbm %s2189_s16, 32 }
 0x673   : > { %p1731_p2 = scmp.ne.s32.totalorder %s2189_s16, %s1730_s19  ;;  %p1736_p3 = scmp.lt.u32.totalorder %s1730_s19, %s2189_s16 }
 0x675   : > { %p1732_p11 = pnand %p1731_p2, %p1584_p4 }
 0x677   : > { %p1733_p13 = pneg %p1732_p11 }
 0x679   : > { %p1738_p9 = pnand %p1736_p3, %p1733_p13 }
 0x67b   : > { %1741 = shalt.err (!%p1738_p9)
}
 0x67c   : > { %1574 = dma.vmem_to_hbm [thread:$0]  (%p1584_p4), %s1284_s22, 32, %s2189_s16, [#allocation9]  }
 0x67d   : > { %1763 = dma.done.wait (%p1584_p4), [#allocation6], 32  }
 0x67e   : > { %1765 = vsyncadd (%p1584_p4), [#allocation6], 4294967264 }
 0x67f   : > { %1767 = dma.done.wait (%p1584_p4), [#allocation9], 32  }
 0x680   : > { %1769 = vsyncadd (%p1584_p4), [#allocation9], 4294967264 }
 0x681 PF: > { %s2205_s24 = sld [smem:[#allocation15_spill]]  ;;  %s2206_s21 = sld [smem:[#allocation13_spill]] }
 0x682   : > { %s2207_s22 = sld [smem:[#allocation14_spill]]  ;;  %s2208_s23 = sld [smem:[#allocation16_spill]] }
 0x687   : > { %p29_p7 = scmp.ge.s32.totalorder %s2205_s24, 4  }
 0x689   :  { %31 = sbr.rel (!%p29_p7) target bundleno = 8 (0x8), region = 142 }
 0x690   :  { %1300 = vsyncpa [#allocation5], 1 }
 0x691   :  { %1302 = vsyncpa [#allocation5 + $0x1], 1 }
 0x692   :  { %1303 = vsyncpa [#allocation6], 1 }
 0x693   :  { %1305 = vsyncpa [#allocation6 + $0x1], 1 }
 0x694   :  { %1306 = vsyncpa [#allocation9], 1 }

</bundles_post_ra>
